<compile_context>
chip_gen: v7x
topology: tpu7x:2x2x1
jax: 0.10.0
libtpu: 0.0.40
codegen_flags: <defaults>
</compile_context>

<pallas_src>
import jax
import jax.numpy as jnp
from jax.experimental import pallas as pl
from jax.experimental.pallas import tpu as pltpu

EPS = 1e-8


def _wn_add_kernel(w1_ref, w2_ref, x1_ref, x2_ref, o_ref):
    # w1/w2: (block_r, 1) per-row weights, broadcast across the lane axis.
    # x1/x2/o: (block_r, block_l) tiles with H*W on the 128-lane axis.
    w1 = w1_ref[...]
    w2 = w2_ref[...]
    acc = x1_ref[...].astype(jnp.float32) * w1 + x2_ref[...].astype(jnp.float32) * w2
    o_ref[...] = acc.astype(o_ref.dtype)


def _choose_blocks(rows, cols, itemsize, target_bytes, max_lane_block=8192):
    """Pick a (block_r, block_l) tile that is lane-dense and ~target_bytes."""
    # Lane (last) axis: use the full extent when it is modest, else a
    # 128-multiple chunk (ragged tail handled by Pallas).
    block_l = cols if cols <= max_lane_block else max_lane_block

    rows_per_tile = max(1, target_bytes // (block_l * itemsize))
    if rows_per_tile >= rows:
        block_r = rows                      # full dim -> always legal
    else:
        block_r = min(rows, max(8, (rows_per_tile // 8) * 8))  # multiple of 8

    # v7x megacore hint: if the whole array would be a single large tile,
    # split the row axis so the grid can shard across the 2 TensorCores.
    if (block_r == rows and block_l == cols and rows >= 16
            and rows * cols * itemsize > (1 << 20)):
        half = (rows + 1) // 2
        block_r = max(8, ((half + 7) // 8) * 8)

    return block_r, block_l


def wn_add(x1, x2, scale1, scale2, *, target_tile_bytes=4 << 20):
    """x1, x2: (N, C, H, W); scale1, scale2: (C,). Returns (N, C, H, W)."""
    N, C, H, W = x1.shape
    assert x2.shape == x1.shape
    rows, cols = N * C, H * W

    # Per-channel weights, computed once (rsqrt instead of sqrt + divide).
    s1 = scale1.astype(jnp.float32)
    s2 = scale2.astype(jnp.float32)
    inv_t = jax.lax.rsqrt(jnp.maximum(s1 * s1 + s2 * s2, EPS))
    w1 = s1 * inv_t
    w2 = s2 * inv_t
    # One weight per (n, c) row of the flattened (N*C, H*W) view (tiny array).
    w1_rows = jnp.broadcast_to(w1[None, :], (N, C)).reshape(rows, 1)
    w2_rows = jnp.broadcast_to(w2[None, :], (N, C)).reshape(rows, 1)

    # Native-layout views: NCHW -> (N*C, H*W).  No transpose, no pad.
    x1f = x1.reshape(rows, cols)
    x2f = x2.reshape(rows, cols)

    itemsize = jnp.dtype(x1.dtype).itemsize
    block_r, block_l = _choose_blocks(rows, cols, itemsize, target_tile_bytes)
    grid = (pl.cdiv(rows, block_r), pl.cdiv(cols, block_l))

    out = pl.pallas_call(
        _wn_add_kernel,
        out_shape=jax.ShapeDtypeStruct((rows, cols), x1.dtype),
        grid_spec=pltpu.PrefetchScalarGridSpec(
            num_scalar_prefetch=0,
            grid=grid,
            in_specs=[
                pl.BlockSpec((block_r, 1), lambda i, j: (i, 0)),        # w1 col
                pl.BlockSpec((block_r, 1), lambda i, j: (i, 0)),        # w2 col
                pl.BlockSpec((block_r, block_l), lambda i, j: (i, j)),  # x1 tile
                pl.BlockSpec((block_r, block_l), lambda i, j: (i, j)),  # x2 tile
            ],
            out_specs=pl.BlockSpec((block_r, block_l), lambda i, j: (i, j)),
        ),
        compiler_params=pltpu.CompilerParams(
            dimension_semantics=("parallel", "parallel"),
            # ~26 MiB of double-buffered tiles at the 4 MiB target; 48 MiB
            # headroom fits v7x (64 MiB VMEM) and lifts v5e's 16 MiB default.
            vmem_limit_bytes=48 << 20,
        ),
    )(w1_rows, w2_rows, x1f, x2f)

    return out.reshape(N, C, H, W)


def wn_add_reference(x1, x2, scale1, scale2):
    t = jnp.sqrt(jnp.maximum(scale1 ** 2 + scale2 ** 2, EPS))
    w1 = (scale1 / t).reshape(1, -1, 1, 1)
    w2 = (scale2 / t).reshape(1, -1, 1, 1)
    return x1 * w1 + x2 * w2


if __name__ == "__main__":
    # Deterministic parameter init (as in WNAdd.__init__).
    num_features = 4
    init1, init2 = 1.0, 0.5
    t0 = (init1 ** 2 + init2 ** 2) ** 0.5
    scale1 = jnp.full((num_features,), init1 / t0, dtype=jnp.float32)
    scale2 = jnp.full((num_features,), init2 / t0, dtype=jnp.float32)

    # Example inputs: NCHW with batch=2, channels=4, spatial=16.
    key = jax.random.PRNGKey(0)
    k1, k2 = jax.random.split(key)
    x1 = jax.random.normal(k1, (2, num_features, 16, 16), dtype=jnp.float32)
    x2 = jax.random.normal(k2, (2, num_features, 16, 16), dtype=jnp.float32)

    out = jax.block_until_ready(wn_add(x1, x2, scale1, scale2))

    ref = wn_add_reference(x1, x2, scale1, scale2)
    assert out.shape == ref.shape
    assert jnp.allclose(out, ref, atol=1e-5, rtol=1e-5)

    print("KERNEL_OK")
</pallas_src>

<mosaic_0001>
module attributes {stable_mosaic.version = 11 : i64} {
  func.func @_wn_add_kernel(%arg0: i32, %arg1: i32, %arg2: memref<8x1xf32, #tpu.memory_space<vmem>>, %arg3: memref<8x1xf32, #tpu.memory_space<vmem>>, %arg4: memref<8x256xf32, #tpu.memory_space<vmem>>, %arg5: memref<8x256xf32, #tpu.memory_space<vmem>>, %arg6: memref<8x256xf32, #tpu.memory_space<vmem>>) attributes {dimension_semantics = [#tpu.dimension_semantics<parallel>, #tpu.dimension_semantics<parallel>], iteration_bounds = array<i64: 1, 1>, scalar_prefetch = 0 : i64, scratch_operands = 0 : i64, tpu.core_type = #tpu.core_type<tc>, window_params = [{transform_indices = @transform_0, window_bounds = array<i64: 8, 1>}, {transform_indices = @transform_1, window_bounds = array<i64: 8, 1>}, {transform_indices = @transform_2, window_bounds = array<i64: 8, 256>}, {transform_indices = @transform_3, window_bounds = array<i64: 8, 256>}, {transform_indices = @transform_4, window_bounds = array<i64: 8, 256>}]} {
    %c0 = arith.constant 0 : index
    %c0_0 = arith.constant 0 : index
    %0 = vector.load %arg2[%c0, %c0_0] : memref<8x1xf32, #tpu.memory_space<vmem>>, vector<8x1xf32>
    %c0_1 = arith.constant 0 : index
    %c0_2 = arith.constant 0 : index
    %1 = vector.load %arg3[%c0_1, %c0_2] : memref<8x1xf32, #tpu.memory_space<vmem>>, vector<8x1xf32>
    %c0_3 = arith.constant 0 : index
    %c0_4 = arith.constant 0 : index
    %2 = vector.load %arg4[%c0_3, %c0_4] : memref<8x256xf32, #tpu.memory_space<vmem>>, vector<8x256xf32>
    %3 = vector.broadcast %0 : vector<8x1xf32> to vector<8x256xf32>
    %4 = arith.mulf %2, %3 : vector<8x256xf32>
    %c0_5 = arith.constant 0 : index
    %c0_6 = arith.constant 0 : index
    %5 = vector.load %arg5[%c0_5, %c0_6] : memref<8x256xf32, #tpu.memory_space<vmem>>, vector<8x256xf32>
    %6 = vector.broadcast %1 : vector<8x1xf32> to vector<8x256xf32>
    %7 = arith.mulf %5, %6 : vector<8x256xf32>
    %8 = arith.addf %4, %7 : vector<8x256xf32>
    %c0_7 = arith.constant 0 : index
    %c0_8 = arith.constant 0 : index
    %9 = vector.load %arg6[%c0_7, %c0_8] : memref<8x256xf32, #tpu.memory_space<vmem>>, vector<8x256xf32>
    tpu.vector_store %arg6[%c0_7, %c0_8], %8 {strides = array<i32>} : memref<8x256xf32, #tpu.memory_space<vmem>>, vector<8x256xf32>,
    return
  }
  func.func @transform_0(%arg0: i32, %arg1: i32) -> (i32, i32) {
    %c0_i32 = arith.constant 0 : i32
    %c0_i32_0 = arith.constant 0 : i32
    return %arg0, %c0_i32 : i32, i32
  }
  func.func @transform_1(%arg0: i32, %arg1: i32) -> (i32, i32) {
    %c0_i32 = arith.constant 0 : i32
    %c0_i32_0 = arith.constant 0 : i32
    return %arg0, %c0_i32 : i32, i32
  }
  func.func @transform_2(%arg0: i32, %arg1: i32) -> (i32, i32) {
    %c0_i32 = arith.constant 0 : i32
    return %arg0, %arg1 : i32, i32
  }
  func.func @transform_3(%arg0: i32, %arg1: i32) -> (i32, i32) {
    %c0_i32 = arith.constant 0 : i32
    return %arg0, %arg1 : i32, i32
  }
  func.func @transform_4(%arg0: i32, %arg1: i32) -> (i32, i32) {
    %c0_i32 = arith.constant 0 : i32
    return %arg0, %arg1 : i32, i32
  }
}

</mosaic_0001>

<bundles_post_ra>
// kernel: tpu_custom_call.1
= control target key start
LH: loop header
LB: loop body
LE: loop exit
PB: predicated region body
PF: predicated region fallthrough
CT: control target
= control target key end

     0   :  { %9 = vsyncpa [#allocation3], 0  ;;  %s185_s0 = inlined_call_operand.vmem [shape: f32[8,1], index: 0, kind: input, shape index: {}]   ;;  %s186_s1 = inlined_call_operand.vmem [shape: f32[8,1], index: 1, kind: input, shape index: {}]   ;;  %s187_s2 = inlined_call_operand.vmem [shape: f32[8,256], index: 2, kind: input, shape index: {}]   ;;  %s188_s3 = inlined_call_operand.hbm [shape: f32[8,256], index: 3, kind: input, shape index: {}]   ;;  %s189_s4 = inlined_call_operand.hbm [shape: f32[8,256], index: 4, kind: output, shape index: {}]  }
   0x1   :  { %10 = vsyncpa [#allocation4], 0  ;;  %s121_s15 = smov [#allocation2]   ;;  %s73_s19 = scalar_lea.hbm %s188_s3, 256 }
   0x2   :  { %s23_s16 = sshll.u32 %s121_s15, 4  ;;  %p74_p0 = scmp.ne.s32.totalorder %s188_s3, %s73_s19  ;;  %s24_s16 = int_to_ptr.vmem [resolvable:$true] %s23_s16 }
   0x3   :  { %p77_p1 = scmp.lt.u32.totalorder %s73_s19, %s188_s3 }
   0x5   :  { %p79_p2 = pnand %p77_p1, %p74_p0 }
   0x7   :  { %82 = shalt.err (!%p79_p2)
}
   0x8   :  { %s83_s24 = scalar_lea.vmem %s24_s16, 256  ;;  %p88_p4 = scmp.lt.s32.totalorder %s24_s16, %s24_s16 }
   0x9   :  { %p84_p3 = scmp.ne.s32.totalorder %s24_s16, %s83_s24  ;;  %p89_p5 = scmp.lt.s32.totalorder %s83_s24, %s83_s24 }
   0xb   :  { %p90_p6 = por %p89_p5, %p88_p4 }
   0xd   :  { %p91_p7 = pnand %p90_p6, %p84_p3 }
   0xf   :  { %94 = shalt.err (!%p91_p7)
}
  0x10   :  { %26 = dma.hbm_to_vmem [thread:$0]  %s188_s3, 256, %s24_s16, [#allocation3]  }
  0x11   :  { %117 = dma.done.wait [#allocation3], 256  }
  0x12   :  { %118 = vsyncadd [#allocation3], 4294967040  ;;  %v122_v0 = vmov 0   ;;  %v30_v1 = vld [vmem:[%s185_s0] sm:$0xff]  ;;  %v33_v5 = vld [vmem:[%s187_s2 + $0x8] sm:$0xff]  ;;  %s123_s8 = smov [#allocation5]  }
  0x13   :  { %72 = vset.pattern.permute.xlu0 %v122_v0  ;;  %v31_v2 = vld [vmem:[%s186_s1] sm:$0xff]  ;;  %v41_v6 = vld [vmem:[#allocation2] sm:$0xff]  ;;  %s60_s0 = sshll.u32 %s123_s8, 4  ;;  %s61_s0 = int_to_ptr.vmem [resolvable:$true] %s60_s0 }
  0x14   :  { %36 = vperm.xlu0 %72, %v30_v1   ;;  %v32_v4 = vld [vmem:[%s187_s2] sm:$0xff]  ;;  %s95_s1 = scalar_lea.vmem %s61_s0, 256  ;;  %p100_p9 = scmp.lt.s32.totalorder %s61_s0, %s61_s0 }
  0x15   :  { %v42_v7 = vld [vmem:[#allocation2 + $0x8] sm:$0xff]  ;;  %p96_p8 = scmp.ne.s32.totalorder %s61_s0, %s95_s1  ;;  %p101_p10 = scmp.lt.s32.totalorder %s95_s1, %s95_s1 }
  0x17   :  { %p102_p11 = por %p101_p10, %p100_p9 }
  0x18   :  { %45 = vperm.xlu0 %72, %v31_v2  }
  0x19   :  { %p103_p12 = pnand %p102_p11, %p96_p8 }
  0x93   :  { %v37_v3 = vpop.permute.xlu0 %36 }
  0x94   :  { %v39_v9 = vmul.f32 %v37_v3, %v32_v4  ;;  %v40_v10 = vmul.f32 %v37_v3, %v33_v5 }
  0x97   :  { %v46_v8 = vpop.permute.xlu0 %45 }
  0x98   :  { %v48_v11 = vmul.f32 %v46_v8, %v41_v6  ;;  %v49_v12 = vmul.f32 %v46_v8, %v42_v7 }
  0x9a   :  { %v50_v13 = vadd.f32 %v48_v11, %v39_v9  ;;  %v51_v14 = vadd.f32 %v49_v12, %v40_v10 }
  0x9c   :  { %52 = vst [vmem:[#allocation5] sm:$0xff] %v50_v13  ;;  %53 = vst [vmem:[#allocation5 + $0x8] sm:$0xff] %v51_v14 }
  0x9d   :  { %106 = shalt.err (!%p103_p12)
}
  0x9e   :  { %s107_s10 = scalar_lea.hbm %s189_s4, 256 }
  0x9f   :  { %p108_p13 = scmp.ne.s32.totalorder %s189_s4, %s107_s10  ;;  %p111_p0 = scmp.lt.u32.totalorder %s107_s10, %s189_s4 }
  0xa1   :  { %p113_p1 = pnand %p111_p0, %p108_p13 }
  0xa3   :  { %116 = shalt.err (!%p113_p1)
}
  0xa4   :  { %63 = dma.vmem_to_hbm [thread:$0]  %s61_s0, 256, %s189_s4, [#allocation4]  }
  0xa5   :  { %119 = dma.done.wait [#allocation4], 256  }
  0xa6   :  { %120 = vsyncadd [#allocation4], 4294967040 }
  0xa7   :  { %67 = vsyncpa [#allocation3], 1 }
  0xa8   :  { %68 = vsyncpa [#allocation4], 1 }

</bundles_post_ra>
